<compile_context>
chip_gen: v5e
topology: v5e:2x2
jax: 0.10.0
libtpu: 0.0.40
codegen_flags: <defaults>
</compile_context>

<pallas_src>
import functools

import jax
import jax.numpy as jnp
from jax import lax
from jax.experimental import pallas as pl
from jax.experimental.pallas import tpu as pltpu


# -----------------------------------------------------------------------------
# Small helpers
# -----------------------------------------------------------------------------
def _round_up(x, m):
    return (x + m - 1) // m * m


def _vmem_capacity_bytes():
    try:
        return int(pltpu.get_tpu_info().vmem_capacity_bytes)
    except Exception:
        return 64 * 1024 * 1024  # conservative: smallest per-TC VMEM (v7x)


def _choose_tile_s(BS, K, Cin, widths_pad, cap):
    """Centroid groups per grid step, sized by a per-generation VMEM budget.

    Push the tile as large as the VMEM budget allows (measured tile sweeps:
    big tiles recover 60-85% of roofline, tiny ones <30%), but keep >= 2 grid
    blocks when the problem allows (pipeline depth; feeds both v7x TCs)."""
    max_w = max(widths_pad)
    out_w = widths_pad[-1]
    # Approximate VMEM bytes needed per centroid group in one grid step:
    #   bf16 input rows (double-buffered), ~3 live f32 activations / matmul
    #   temps, f32 output rows (double-buffered).
    per_group = (2 * K * max(Cin, 1) * 2
                 + 3 * K * max_w * 4
                 + 2 * out_w * 4)
    budget = int(0.35 * cap)
    ts = budget // max(per_group, 1)
    ts = min(ts, max(8192 // max(K, 1), 8))   # bound rows/step (vreg pressure)
    ts = max(8, ts // 8 * 8)                  # sublane multiple
    while ts > 8 and pl.cdiv(BS, ts) < 2:
        ts = max(8, (ts // 2) // 8 * 8)
    return ts


def _vmem_limit_bytes(ts, K, Cin, widths_pad, cap):
    """Scoped-VMEM limit: raise the default when useful, but never over-ask on
    64-MiB-VMEM parts (v7x)."""
    max_w = max(widths_pad)
    out_w = widths_pad[-1]
    in_tile = ts * K * max(Cin, 1) * 2                 # bf16
    out_tile = ts * out_w * 4                          # f32
    acts = 3 * ts * K * max_w * 4                      # f32 temps
    wts = Cin * widths_pad[0] * 2
    for a, b in zip(widths_pad[:-1], widths_pad[1:]):
        wts += a * b * 2
    wts += sum(8 * w * 4 for w in widths_pad)          # biases (sublane-padded)
    est = 2 * (in_tile + out_tile + wts) + acts        # 2x = double buffering
    return int(min(0.6 * cap, max(2 * est, 32 << 20)))


# -----------------------------------------------------------------------------
# Pallas kernel: shared-MLP chain (bf16 MXU, f32 accumulate) + max over K
# -----------------------------------------------------------------------------
def _branch_kernel(n_layers, K, x_ref, *refs):
    """x_ref: (TS*K, Cin) bf16.
    refs = (w_0, ..., w_{L-1}, b_0, ..., b_{L-1}, out):
      w_l: (Cin_l_pad, Cout_l_pad) bf16 (per-layer 128-padded, zero-padded)
      b_l: (1, Cout_l_pad) f32
      out: (TS, Cout_last_pad) f32
    Padded weight columns / bias entries are zero, so padded lanes stay 0
    through ReLU and never leak into real channels of later layers."""
    out_ref = refs[-1]
    w_refs = refs[:n_layers]
    b_refs = refs[n_layers:2 * n_layers]

    h = x_ref[...]                                           # bf16 rows
    acc = jnp.dot(h, w_refs[0][...], preferred_element_type=jnp.float32)
    acc = jnp.maximum(acc + b_refs[0][...], 0.0)
    for l in range(1, n_layers):
        acc = jnp.dot(acc.astype(jnp.bfloat16), w_refs[l][...],
                      preferred_element_type=jnp.float32)
        acc = jnp.maximum(acc + b_refs[l][...], 0.0)
    ts = acc.shape[0] // K
    # K is padded to a multiple of 8, so this reshape is layout-preserving.
    acc = acc.reshape(ts, K, acc.shape[-1])
    out_ref[...] = jnp.max(acc, axis=1).astype(out_ref.dtype)


def _pack_params(weights, biases, Cin, widths, widths_pad):
    """Per-layer padded weights (bf16) and biases (f32).  Padded rows/cols are
    zero so padded lanes never leak."""
    n_layers = len(weights)
    w_list, b_list = [], []
    for l in range(n_layers):
        cpi = Cin if l == 0 else widths_pad[l - 1]
        cpo = widths_pad[l]
        w = jnp.zeros((cpi, cpo), jnp.bfloat16)
        w = w.at[:weights[l].shape[0], :widths[l]].set(
            weights[l].astype(jnp.bfloat16))
        b = jnp.zeros((1, cpo), jnp.float32)
        b = b.at[0, :widths[l]].set(biases[l].astype(jnp.float32))
        w_list.append(w)
        b_list.append(b)
    return w_list, b_list


def branch_mlp_max(points_flat_bf16, center_off_bf16, group_idx_flat,
                   weights, biases):
    """Gather K neighbour rows per centroid group and run the shared MLP + max.

    points_flat_bf16: (B*N, Cin) bf16 -- [features, xyz] per point.
    center_off_bf16:  (BS, Cin) bf16 -- zeros for feature channels, centroid
                      xyz for the last 3 channels.
    group_idx_flat:   (BS, K) int32 flat indices into points_flat_bf16.
    Returns (BS, Cout) f32.
    """
    BS, K = group_idx_flat.shape
    Cin = points_flat_bf16.shape[1]
    n_layers = len(weights)
    widths = [int(w.shape[1]) for w in weights]
    widths_pad = [_round_up(c, 128) for c in widths]
    Cout, Cout_pad = widths[-1], widths_pad[-1]

    # K padded to a multiple of 8 (sublane tile) by duplicating the first
    # neighbour; duplicates cannot change the max, so semantics are preserved.
    K_pad = _round_up(K, 8)
    if K_pad != K:
        group_idx_flat = jnp.concatenate(
            [group_idx_flat,
             jnp.broadcast_to(group_idx_flat[:, :1], (BS, K_pad - K))], axis=1)

    cap = _vmem_capacity_bytes()
    ts = _choose_tile_s(BS, K_pad, Cin, widths_pad, cap)
    BS_pad = _round_up(BS, ts)
    if BS_pad != BS:
        pad = BS_pad - BS
        group_idx_flat = jnp.concatenate(
            [group_idx_flat, jnp.zeros((pad, K_pad), jnp.int32)], axis=0)
        center_off_bf16 = jnp.concatenate(
            [center_off_bf16,
             jnp.zeros((pad, Cin), center_off_bf16.dtype)], axis=0)

    # One gather straight into bf16 rows + fused centroid subtract; the final
    # reshape to (BS_pad*K_pad, Cin) is a free row-major relabel.
    grouped = jnp.take(points_flat_bf16, group_idx_flat, axis=0)
    x = (grouped - center_off_bf16[:, None, :]).reshape(BS_pad * K_pad, Cin)

    w_list, b_list = _pack_params(weights, biases, Cin, widths, widths_pad)

    in_specs = [pl.BlockSpec((ts * K_pad, Cin), lambda i: (i, 0))]
    for w in w_list:
        in_specs.append(pl.BlockSpec(w.shape, lambda i: (0, 0)))
    for b in b_list:
        in_specs.append(pl.BlockSpec(b.shape, lambda i: (0, 0)))

    out = pl.pallas_call(
        functools.partial(_branch_kernel, n_layers, K_pad),
        out_shape=jax.ShapeDtypeStruct((BS_pad, Cout_pad), jnp.float32),
        grid=(BS_pad // ts,),
        in_specs=in_specs,
        out_specs=pl.BlockSpec((ts, Cout_pad), lambda i: (i, 0)),
        compiler_params=pltpu.CompilerParams(
            dimension_semantics=("parallel",),
            vmem_limit_bytes=_vmem_limit_bytes(ts, K_pad, Cin, widths_pad, cap)),
    )(x, *w_list, *b_list)

    # Output is K_pad x smaller than the input; the slice/reshape/transpose
    # outside fuse into one small XLA copy.
    return out[:BS, :Cout]


def _branch_ref(x_grouped, weights, biases):
    """Pure-JAX f32 reference for the hot path (validation only)."""
    h = x_grouped.astype(jnp.float32)
    for w, b in zip(weights, biases):
        h = jnp.maximum(jnp.einsum('bkc,cd->bkd', h, w) + b.reshape(-1), 0.0)
    return jnp.max(h, axis=1)


# -----------------------------------------------------------------------------
# Plain-JAX glue: FPS, ball query, gather (data-dependent / sequential)
# -----------------------------------------------------------------------------
def square_distance(src, dst):
    # ||s||^2 + ||d||^2 - 2 s.d  (matmul form, no [B,S,N,3] intermediate)
    s2 = jnp.sum(src * src, axis=-1)[:, :, None]
    d2 = jnp.sum(dst * dst, axis=-1)[:, None, :]
    cross = jnp.einsum('bsc,bnc->bsn', src, dst)
    return s2 + d2 - 2.0 * cross


def farthest_point_sample(xyz, npoint):
    # xyz [B,N,3] -> [B,npoint] int32.  Deterministic: start from point 0.
    B, N, _ = xyz.shape

    def body(i, state):
        centroids, distance, farthest = state
        centroids = centroids.at[:, i].set(farthest)
        centroid = jnp.take_along_axis(
            xyz, jnp.broadcast_to(farthest[:, None, None], (B, 1, 3)), axis=1)
        dist = jnp.sum((xyz - centroid) ** 2, axis=-1)
        distance = jnp.minimum(distance, dist)
        farthest = jnp.argmax(distance, axis=-1).astype(jnp.int32)
        return centroids, distance, farthest

    centroids = jnp.zeros((B, npoint), dtype=jnp.int32)
    distance = jnp.full((B, N), 1e10, dtype=jnp.float32)
    farthest = jnp.zeros((B,), dtype=jnp.int32)
    centroids, _, _ = lax.fori_loop(0, npoint, body,
                                    (centroids, distance, farthest))
    return centroids


def query_ball_point(radius, nsample, xyz, new_xyz):
    B, N, _ = xyz.shape
    S = new_xyz.shape[1]
    sqrdists = square_distance(new_xyz, xyz)                        # [B,S,N]
    idx = jnp.broadcast_to(
        jnp.arange(N, dtype=jnp.int32)[None, None, :], (B, S, N))
    idx = jnp.where(sqrdists > radius ** 2, N, idx)
    # smallest `nsample` indices in ascending order (== sort+slice, O(N*k))
    neg_topk, _ = lax.top_k(-idx, nsample)
    group_idx = (-neg_topk).astype(jnp.int32)
    group_first = group_idx[:, :, :1]
    group_idx = jnp.where(group_idx == N, group_first, group_idx)
    return group_idx


def index_points(points, idx):
    # points [B,N,C], idx [B,...] -> [B,...,C]
    B, _, C = points.shape
    idx_flat = idx.reshape(B, -1)
    gathered = jnp.take_along_axis(
        points, jnp.broadcast_to(idx_flat[..., None],
                                 (B, idx_flat.shape[1], C)), axis=1)
    return gathered.reshape(idx.shape + (C,))


# -----------------------------------------------------------------------------
# Module: parameter init + BN folding + forward
# -----------------------------------------------------------------------------
def init_params(key, in_channel, mlp_list):
    """Deterministic Conv2d(1x1) + BatchNorm2d params per branch."""
    params = []
    for mlp in mlp_list:
        branch = []
        last = in_channel
        for out_ch in mlp:
            key, kw, kb, kg, kbeta, km, kv = jax.random.split(key, 7)
            w = jax.random.normal(kw, (last, out_ch), jnp.float32) * 0.1
            b = jax.random.normal(kb, (out_ch,), jnp.float32) * 0.1
            gamma = 1.0 + 0.1 * jax.random.normal(kg, (out_ch,), jnp.float32)
            beta = 0.1 * jax.random.normal(kbeta, (out_ch,), jnp.float32)
            mean = 0.1 * jax.random.normal(km, (out_ch,), jnp.float32)
            var = jnp.abs(jax.random.normal(kv, (out_ch,), jnp.float32)) + 0.5
            branch.append(dict(w=w, b=b, gamma=gamma, beta=beta,
                               mean=mean, var=var))
            last = out_ch
        params.append(branch)
    return params


def fold_bn(layer, eps=1e-5):
    """Fold eval-mode BatchNorm into the 1x1-conv weight/bias."""
    scale = layer["gamma"] / jnp.sqrt(layer["var"] + eps)            # (Cout,)
    w_eff = layer["w"] * scale[None, :]                              # (Cin,Cout)
    b_eff = (layer["b"] - layer["mean"]) * scale + layer["beta"]     # (Cout,)
    return w_eff, b_eff


def pointnet_sa_msg_forward(xyz, points, params, npoint,
                            radius_list, nsample_list, use_pallas=True):
    """
    xyz:    [B, 3, N]   point positions
    points: [B, D, N]   point features (may be None)
    returns new_xyz [B, 3, S], new_points_concat [B, sum(mlp[-1]), S]
    """
    xyz_t = jnp.transpose(xyz, (0, 2, 1))                            # [B,N,3]
    points_t = None if points is None else jnp.transpose(points, (0, 2, 1))
    B, N, _ = xyz_t.shape
    S = npoint

    fps_idx = farthest_point_sample(xyz_t, S)                        # [B,S]
    new_xyz = index_points(xyz_t, fps_idx)                           # [B,S,3]

    # Kernel input built once per forward, already in its final form:
    # [features, xyz] per point, cast to bf16, flattened over (B, N).
    if points_t is not None:
        feat = jnp.concatenate([points_t, xyz_t], axis=-1)           # [B,N,D+3]
    else:
        feat = xyz_t
    Cin = feat.shape[-1]
    D = Cin - 3
    feat_flat_bf16 = feat.astype(jnp.bfloat16).reshape(B * N, Cin)
    center_off = jnp.concatenate(
        [jnp.zeros((B, S, D), jnp.float32), new_xyz], axis=-1)       # [B,S,Cin]
    center_off_bf16 = center_off.astype(jnp.bfloat16).reshape(B * S, Cin)
    batch_base = (jnp.arange(B, dtype=jnp.int32) * N)[:, None, None]

    new_points_list = []
    for i, radius in enumerate(radius_list):
        K = nsample_list[i]
        group_idx = query_ball_point(radius, K, xyz_t, new_xyz)      # [B,S,K]
        weights, biases = zip(*(fold_bn(l) for l in params[i]))
        if use_pallas:
            flat_idx = (group_idx + batch_base).reshape(B * S, K)
            out_rows = branch_mlp_max(feat_flat_bf16, center_off_bf16,
                                      flat_idx, list(weights), list(biases))
        else:
            grouped_xyz = index_points(xyz_t, group_idx) - new_xyz[:, :, None, :]
            if points_t is not None:
                grouped = jnp.concatenate(
                    [index_points(points_t, group_idx), grouped_xyz], axis=-1)
            else:
                grouped = grouped_xyz
            out_rows = _branch_ref(grouped.reshape(B * S, K, Cin),
                                   list(weights), list(biases))
        Cout = out_rows.shape[-1]
        new_points_list.append(
            jnp.transpose(out_rows.reshape(B, S, Cout), (0, 2, 1)))  # [B,Cout,S]

    new_xyz_out = jnp.transpose(new_xyz, (0, 2, 1))                  # [B,3,S]
    new_points_concat = jnp.concatenate(new_points_list, axis=1)
    return new_xyz_out, new_points_concat


# -----------------------------------------------------------------------------
if __name__ == "__main__":
    B, N, D = 2, 32, 3
    npoint = 16
    radius_list = [0.4, 0.8]
    nsample_list = [8, 16]
    in_channel = D + 3          # features concatenated with relative xyz
    mlp_list = [[8, 16], [16, 32]]

    key = jax.random.PRNGKey(0)
    kx, kp, kparam = jax.random.split(key, 3)
    xyz = jax.random.uniform(kx, (B, 3, N), jnp.float32)
    points = jax.random.normal(kp, (B, D, N), jnp.float32)
    params = init_params(kparam, in_channel, mlp_list)

    fwd_pallas = jax.jit(
        lambda xyz_, points_, params_: pointnet_sa_msg_forward(
            xyz_, points_, params_, npoint, radius_list, nsample_list,
            use_pallas=True))
    new_xyz, new_points = fwd_pallas(xyz, points, params)
    jax.block_until_ready((new_xyz, new_points))

    assert new_xyz.shape == (B, 3, npoint)
    assert new_points.shape == (B, sum(m[-1] for m in mlp_list), npoint)

    # Validate the Pallas path against a pure-JAX f32 reference.
    # (Relaxed tolerance: kernel path uses bf16 grouped activations and bf16
    #  folded weights on the MXU with f32 accumulation.)
    _, ref_points = pointnet_sa_msg_forward(
        xyz, points, params, npoint, radius_list, nsample_list,
        use_pallas=False)
    max_err = float(jnp.max(jnp.abs(new_points - ref_points)))
    assert max_err < 6e-2, f"Pallas vs reference mismatch: max_err={max_err}"

    print("KERNEL_OK")
</pallas_src>

<mosaic_0001>
module attributes {stable_mosaic.version = 11 : i64} {
  func.func @_branch_kernel(%arg0: i32, %arg1: memref<128x6xbf16, #tpu.memory_space<vmem>>, %arg2: memref<6x128xbf16, #tpu.memory_space<vmem>>, %arg3: memref<128x128xbf16, #tpu.memory_space<vmem>>, %arg4: memref<1x128xf32, #tpu.memory_space<vmem>>, %arg5: memref<1x128xf32, #tpu.memory_space<vmem>>, %arg6: memref<16x128xf32, #tpu.memory_space<vmem>>) attributes {dimension_semantics = [#tpu.dimension_semantics<parallel>], iteration_bounds = array<i64: 2>, scalar_prefetch = 0 : i64, scratch_operands = 0 : i64, tpu.core_type = #tpu.core_type<tc>, window_params = [{transform_indices = @transform_0, window_bounds = array<i64: 128, 6>}, {pipeline_mode = #tpu.pipeline_mode<synchronous>, transform_indices = @transform_1, window_bounds = array<i64: 6, 128>}, {pipeline_mode = #tpu.pipeline_mode<synchronous>, transform_indices = @transform_2, window_bounds = array<i64: 128, 128>}, {pipeline_mode = #tpu.pipeline_mode<synchronous>, transform_indices = @transform_3, window_bounds = array<i64: 1, 128>}, {pipeline_mode = #tpu.pipeline_mode<synchronous>, transform_indices = @transform_4, window_bounds = array<i64: 1, 128>}, {transform_indices = @transform_5, window_bounds = array<i64: 16, 128>}]} {
    %c0 = arith.constant 0 : index
    %c0_0 = arith.constant 0 : index
    %0 = vector.load %arg1[%c0, %c0_0] : memref<128x6xbf16, #tpu.memory_space<vmem>>, vector<128x6xbf16>
    %c0_1 = arith.constant 0 : index
    %c0_2 = arith.constant 0 : index
    %1 = vector.load %arg2[%c0_1, %c0_2] : memref<6x128xbf16, #tpu.memory_space<vmem>>, vector<6x128xbf16>
    %cst = arith.constant dense<0.000000e+00> : vector<128x128xf32>
    %2 = tpu.matmul %0, %1, %cst {dimension_numbers = #tpu.dot_dimension_numbers<[1], [0], [0], [1], [0, 0, 1, 1], [], []>} : vector<128x6xbf16>, vector<6x128xbf16>, vector<128x128xf32> -> vector<128x128xf32>
    %c0_3 = arith.constant 0 : index
    %c0_4 = arith.constant 0 : index
    %3 = vector.load %arg4[%c0_3, %c0_4] : memref<1x128xf32, #tpu.memory_space<vmem>>, vector<1x128xf32>
    %4 = vector.broadcast %3 : vector<1x128xf32> to vector<128x128xf32>
    %5 = arith.addf %2, %4 : vector<128x128xf32>
    %cst_5 = arith.constant 0.000000e+00 : f32
    %6 = vector.broadcast %cst_5 : f32 to vector<128x128xf32>
    %7 = arith.maximumf %5, %6 : vector<128x128xf32>
    %8 = arith.truncf %7 : vector<128x128xf32> to vector<128x128xbf16>
    %c0_6 = arith.constant 0 : index
    %c0_7 = arith.constant 0 : index
    %9 = vector.load %arg3[%c0_6, %c0_7] : memref<128x128xbf16, #tpu.memory_space<vmem>>, vector<128x128xbf16>
    %cst_8 = arith.constant dense<0.000000e+00> : vector<128x128xf32>
    %10 = tpu.matmul %8, %9, %cst_8 {dimension_numbers = #tpu.dot_dimension_numbers<[1], [0], [0], [1], [0, 0, 1, 1], [], []>} : vector<128x128xbf16>, vector<128x128xbf16>, vector<128x128xf32> -> vector<128x128xf32>
    %c0_9 = arith.constant 0 : index
    %c0_10 = arith.constant 0 : index
    %11 = vector.load %arg5[%c0_9, %c0_10] : memref<1x128xf32, #tpu.memory_space<vmem>>, vector<1x128xf32>
    %12 = vector.broadcast %11 : vector<1x128xf32> to vector<128x128xf32>
    %13 = arith.addf %10, %12 : vector<128x128xf32>
    %cst_11 = arith.constant 0.000000e+00 : f32
    %14 = vector.broadcast %cst_11 : f32 to vector<128x128xf32>
    %15 = arith.maximumf %13, %14 : vector<128x128xf32>
    %16 = vector.shape_cast %15 : vector<128x128xf32> to vector<16x8x128xf32>
    %cst_12 = arith.constant dense<0xFF800000> : vector<16x128xf32>
    %17 = vector.multi_reduction <maximumf>, %16, %cst_12 [1] : vector<16x8x128xf32> to vector<16x128xf32>
    %c0_13 = arith.constant 0 : index
    %c0_14 = arith.constant 0 : index
    %18 = vector.load %arg6[%c0_13, %c0_14] : memref<16x128xf32, #tpu.memory_space<vmem>>, vector<16x128xf32>
    tpu.vector_store %arg6[%c0_13, %c0_14], %17 {strides = array<i32>} : memref<16x128xf32, #tpu.memory_space<vmem>>, vector<16x128xf32>,
    return
  }
  func.func @transform_0(%arg0: i32) -> (i32, i32) {
    %c0_i32 = arith.constant 0 : i32
    %c0_i32_0 = arith.constant 0 : i32
    return %arg0, %c0_i32 : i32, i32
  }
  func.func @transform_1(%arg0: i32) -> (i32, i32) {
    %c0_i32 = arith.constant 0 : i32
    %c0_i32_0 = arith.constant 0 : i32
    %c0_i32_1 = arith.constant 0 : i32
    return %c0_i32, %c0_i32_0 : i32, i32
  }
  func.func @transform_2(%arg0: i32) -> (i32, i32) {
    %c0_i32 = arith.constant 0 : i32
    %c0_i32_0 = arith.constant 0 : i32
    %c0_i32_1 = arith.constant 0 : i32
    return %c0_i32, %c0_i32_0 : i32, i32
  }
  func.func @transform_3(%arg0: i32) -> (i32, i32) {
    %c0_i32 = arith.constant 0 : i32
    %c0_i32_0 = arith.constant 0 : i32
    %c0_i32_1 = arith.constant 0 : i32
    return %c0_i32, %c0_i32_0 : i32, i32
  }
  func.func @transform_4(%arg0: i32) -> (i32, i32) {
    %c0_i32 = arith.constant 0 : i32
    %c0_i32_0 = arith.constant 0 : i32
    %c0_i32_1 = arith.constant 0 : i32
    return %c0_i32, %c0_i32_0 : i32, i32
  }
  func.func @transform_5(%arg0: i32) -> (i32, i32) {
    %c0_i32 = arith.constant 0 : i32
    %c0_i32_0 = arith.constant 0 : i32
    return %arg0, %c0_i32 : i32, i32
  }
}

module attributes {stable_mosaic.version = 11 : i64} {
  func.func @_branch_kernel(%arg0: i32, %arg1: memref<256x6xbf16, #tpu.memory_space<vmem>>, %arg2: memref<6x128xbf16, #tpu.memory_space<vmem>>, %arg3: memref<128x128xbf16, #tpu.memory_space<vmem>>, %arg4: memref<1x128xf32, #tpu.memory_space<vmem>>, %arg5: memref<1x128xf32, #tpu.memory_space<vmem>>, %arg6: memref<16x128xf32, #tpu.memory_space<vmem>>) attributes {dimension_semantics = [#tpu.dimension_semantics<parallel>], iteration_bounds = array<i64: 2>, scalar_prefetch = 0 : i64, scratch_operands = 0 : i64, tpu.core_type = #tpu.core_type<tc>, window_params = [{transform_indices = @transform_0, window_bounds = array<i64: 256, 6>}, {pipeline_mode = #tpu.pipeline_mode<synchronous>, transform_indices = @transform_1, window_bounds = array<i64: 6, 128>}, {pipeline_mode = #tpu.pipeline_mode<synchronous>, transform_indices = @transform_2, window_bounds = array<i64: 128, 128>}, {pipeline_mode = #tpu.pipeline_mode<synchronous>, transform_indices = @transform_3, window_bounds = array<i64: 1, 128>}, {pipeline_mode = #tpu.pipeline_mode<synchronous>, transform_indices = @transform_4, window_bounds = array<i64: 1, 128>}, {transform_indices = @transform_5, window_bounds = array<i64: 16, 128>}]} {
    %c0 = arith.constant 0 : index
    %c0_0 = arith.constant 0 : index
    %0 = vector.load %arg1[%c0, %c0_0] : memref<256x6xbf16, #tpu.memory_space<vmem>>, vector<256x6xbf16>
    %c0_1 = arith.constant 0 : index
    %c0_2 = arith.constant 0 : index
    %1 = vector.load %arg2[%c0_1, %c0_2] : memref<6x128xbf16, #tpu.memory_space<vmem>>, vector<6x128xbf16>
    %cst = arith.constant dense<0.000000e+00> : vector<256x128xf32>
    %2 = tpu.matmul %0, %1, %cst {dimension_numbers = #tpu.dot_dimension_numbers<[1], [0], [0], [1], [0, 0, 1, 1], [], []>} : vector<256x6xbf16>, vector<6x128xbf16>, vector<256x128xf32> -> vector<256x128xf32>
    %c0_3 = arith.constant 0 : index
    %c0_4 = arith.constant 0 : index
    %3 = vector.load %arg4[%c0_3, %c0_4] : memref<1x128xf32, #tpu.memory_space<vmem>>, vector<1x128xf32>
    %4 = vector.broadcast %3 : vector<1x128xf32> to vector<256x128xf32>
    %5 = arith.addf %2, %4 : vector<256x128xf32>
    %cst_5 = arith.constant 0.000000e+00 : f32
    %6 = vector.broadcast %cst_5 : f32 to vector<256x128xf32>
    %7 = arith.maximumf %5, %6 : vector<256x128xf32>
    %8 = arith.truncf %7 : vector<256x128xf32> to vector<256x128xbf16>
    %c0_6 = arith.constant 0 : index
    %c0_7 = arith.constant 0 : index
    %9 = vector.load %arg3[%c0_6, %c0_7] : memref<128x128xbf16, #tpu.memory_space<vmem>>, vector<128x128xbf16>
    %cst_8 = arith.constant dense<0.000000e+00> : vector<256x128xf32>
    %10 = tpu.matmul %8, %9, %cst_8 {dimension_numbers = #tpu.dot_dimension_numbers<[1], [0], [0], [1], [0, 0, 1, 1], [], []>} : vector<256x128xbf16>, vector<128x128xbf16>, vector<256x128xf32> -> vector<256x128xf32>
    %c0_9 = arith.constant 0 : index
    %c0_10 = arith.constant 0 : index
    %11 = vector.load %arg5[%c0_9, %c0_10] : memref<1x128xf32, #tpu.memory_space<vmem>>, vector<1x128xf32>
    %12 = vector.broadcast %11 : vector<1x128xf32> to vector<256x128xf32>
    %13 = arith.addf %10, %12 : vector<256x128xf32>
    %cst_11 = arith.constant 0.000000e+00 : f32
    %14 = vector.broadcast %cst_11 : f32 to vector<256x128xf32>
    %15 = arith.maximumf %13, %14 : vector<256x128xf32>
    %16 = vector.shape_cast %15 : vector<256x128xf32> to vector<16x16x128xf32>
    %cst_12 = arith.constant dense<0xFF800000> : vector<16x128xf32>
    %17 = vector.multi_reduction <maximumf>, %16, %cst_12 [1] : vector<16x16x128xf32> to vector<16x128xf32>
    %c0_13 = arith.constant 0 : index
    %c0_14 = arith.constant 0 : index
    %18 = vector.load %arg6[%c0_13, %c0_14] : memref<16x128xf32, #tpu.memory_space<vmem>>, vector<16x128xf32>
    tpu.vector_store %arg6[%c0_13, %c0_14], %17 {strides = array<i32>} : memref<16x128xf32, #tpu.memory_space<vmem>>, vector<16x128xf32>,
    return
  }
  func.func @transform_0(%arg0: i32) -> (i32, i32) {
    %c0_i32 = arith.constant 0 : i32
    %c0_i32_0 = arith.constant 0 : i32
    return %arg0, %c0_i32 : i32, i32
  }
  func.func @transform_1(%arg0: i32) -> (i32, i32) {
    %c0_i32 = arith.constant 0 : i32
    %c0_i32_0 = arith.constant 0 : i32
    %c0_i32_1 = arith.constant 0 : i32
    return %c0_i32, %c0_i32_0 : i32, i32
  }
  func.func @transform_2(%arg0: i32) -> (i32, i32) {
    %c0_i32 = arith.constant 0 : i32
    %c0_i32_0 = arith.constant 0 : i32
    %c0_i32_1 = arith.constant 0 : i32
    return %c0_i32, %c0_i32_0 : i32, i32
  }
  func.func @transform_3(%arg0: i32) -> (i32, i32) {
    %c0_i32 = arith.constant 0 : i32
    %c0_i32_0 = arith.constant 0 : i32
    %c0_i32_1 = arith.constant 0 : i32
    return %c0_i32, %c0_i32_0 : i32, i32
  }
  func.func @transform_4(%arg0: i32) -> (i32, i32) {
    %c0_i32 = arith.constant 0 : i32
    %c0_i32_0 = arith.constant 0 : i32
    %c0_i32_1 = arith.constant 0 : i32
    return %c0_i32, %c0_i32_0 : i32, i32
  }
  func.func @transform_5(%arg0: i32) -> (i32, i32) {
    %c0_i32 = arith.constant 0 : i32
    %c0_i32_0 = arith.constant 0 : i32
    return %arg0, %c0_i32 : i32, i32
  }
}

</mosaic_0001>

<bundles_post_ra>
// kernel: custom-call.4
= control target key start
LH: loop header
LB: loop body
LE: loop exit
PB: predicated region body
PF: predicated region fallthrough
CT: control target
= control target key end

     0   :  { %s6_s0 = inlined_call_operand.vmem [shape: f32[2,32], index: 0, kind: output, shape index: {}]  }

// kernel: _lambda_.2
= control target key start
LH: loop header
LB: loop body
LE: loop exit
PB: predicated region body
PF: predicated region fallthrough
CT: control target
= control target key end

     0   :  { %s874_s18 = smov 0   ;;  %s972_s0 = inlined_call_operand.vmem [shape: bf16[256,6], index: 0, kind: input, shape index: {}]   ;;  %s973_s1 = inlined_call_operand.vmem [shape: bf16[6,128], index: 1, kind: input, shape index: {}]   ;;  %s974_s2 = inlined_call_operand.vmem [shape: bf16[128,128], index: 2, kind: input, shape index: {}]   ;;  %s975_s3 = inlined_call_operand.vmem [shape: f32[1,128], index: 3, kind: input, shape index: {}]   ;;  %s976_s4 = inlined_call_operand.vmem [shape: f32[1,128], index: 4, kind: input, shape index: {}]   ;;  %s977_s5 = inlined_call_operand.vmem [shape: f32[32,128], index: 5, kind: output, shape index: {}]  }
   0x1 LB: > { %s718_s19 = sadd.s32 4294967295, %s842_s18   ;;  %p722_p0 = scmp.ge.s32.totalorder %s842_s18, 1  ;;  %s842_s18 = sphi %s874_s18, %s15_s18  }
   0x2   : > { %p188_p1 = scmp.lt.s32.totalorder %s842_s18, 3 }
   0x4   : > { %p189_p2 = pnand %p722_p0, %p188_p1 }
   0x5   : > { %s723_s22 = sshll.u32 (!%p189_p2), %s718_s19, 4  ;;  %s725_s24 = sshll.u32 (!%p189_p2), %s718_s19, 1 }
   0x6   : > { %192 = sbr.rel (%p189_p2) target bundleno = 426 (0x1aa), region = 40  ;;  %p217_p3 = scmp.lt.s32.totalorder (!%p189_p2), %s723_s22, 31 }
   0x7   : > { %p223_p4 = scmp.lt.s32.totalorder (!%p189_p2), %s725_s24, 3 }
   0xb   : > { %v245_v0 = vld [vmem:[%s973_s1] sm:$0x7]  ;;  %vm315_vm0 = vcmask 1042432   ;;  %s979_s22 = smov (!%p217_p3, %s723_s22), 31  ;;  %vm290_vm1 = vcmask 48128   ;;  %v816_v6 = vld [vmem:[%s974_s2 + $0x38] sm:$0xff] }
   0xc   : > { %v317_v1 = vsel %vm315_vm0, %v245_v0, 0  ;;  %s724_s23 = sshll.u32 %s979_s22, 2  ;;  %460 = vmatpush.bf16.msra.mxu1 %v816_v6  ;;  %v815_v7 = vld [vmem:[%s974_s2 + $0x30] sm:$0xff]  ;;  %818 = vmatpush.bf16.msra.mxu2 %v816_v6  ;;  %v814_v8 = vld [vmem:[%s974_s2 + $0x28] sm:$0xff]  ;;  %v813_v10 = vld [vmem:[%s974_s2 + $0x20] sm:$0xff]  ;;  %vm637_vm2 = vcmask 1041409  }
   0xd   : > { %326 = vmatpush.bf16.msra.mxu0 %v317_v1  ;;  %817 = vmatpush.bf16.msra.mxu3 %v317_v1  ;;  %s220_s26 = scalar_lea.vmem %s972_s0, %s724_s23  ;;  %v812_v14 = vld [vmem:[%s974_s2 + $0x18] sm:$0xff]  ;;  %v811_v15 = vld [vmem:[%s974_s2 + $0x10] sm:$0xff]  ;;  %v810_v16 = vld [vmem:[%s974_s2 + $0x8] sm:$0xff]  ;;  %s981_s24 = smov (!%p223_p4, %s725_s24), 3  ;;  %vm639_vm3 = vcmask 1042434   ;;  %vm641_vm4 = vcmask 1043459  }
   0xe   : > { %v801_v2 = vld [vmem:[%s220_s26] sm:$0xff]  ;;  %v802_v3 = vld [vmem:[%s220_s26 + $0x8] sm:$0xff]  ;;  %v803_v4 = vld [vmem:[%s220_s26 + $0x10] sm:$0xff]  ;;  %vm643_vm5 = vcmask 1044484   ;;  %vm645_vm6 = vcmask 1045509   ;;  %s726_s19 = sshll.u32 %s981_s24, 3 }
   0xf   : > { %v806_v5 = vld [vmem:[%s220_s26 + $0x28] sm:$0xff]  ;;  %v804_v9 = vld [vmem:[%s220_s26 + $0x18] sm:$0xff]  ;;  %v807_v11 = vld [vmem:[%s220_s26 + $0x30] sm:$0xff]  ;;  %vm647_vm7 = vcmask 1046534   ;;  %vm649_vm8 = vcmask 1047559   ;;  %s948_s27 = scalar_lea.vmem %s977_s5, %s726_s19 }
  0x10   : > { %759 = vmatmul.msk.bf16.vlgmr.msra.gmra.mxu0 %vm290_vm1, %v801_v2  ;;  %764 = vmatmul.msk.bf16.vlgmr.msra.gmra.mxu3 %vm290_vm1, %v806_v5  ;;  %v805_v12 = vld [vmem:[%s220_s26 + $0x20] sm:$0xff]  ;;  %v808_v13 = vld [vmem:[%s220_s26 + $0x38] sm:$0xff] }
  0x11   : > { %461 = vmatpush.bf16.msra.mxu1 %v815_v7  ;;  %819 = vmatpush.bf16.msra.mxu2 %v815_v7  ;;  %v809_v17 = vld [vmem:[%s974_s2] sm:$0xff] }
  0x12   : > { %v834_v19 = vld [vmem:[%s975_s3] ss:$0 sm:$0xff] }
  0x15   : > { %462 = vmatpush.bf16.msra.mxu1 %v814_v8  ;;  %820 = vmatpush.bf16.msra.mxu2 %v814_v8 }
  0x19   : > { %463 = vmatpush.bf16.msra.mxu1 %v813_v10  ;;  %821 = vmatpush.bf16.msra.mxu2 %v813_v10 }
  0x1d   : > { %464 = vmatpush.bf16.msra.mxu1 %v812_v14  ;;  %822 = vmatpush.bf16.msra.mxu2 %v812_v14 }
  0x20   : > { %760 = vmatmul.msk.bf16.gmra.mxu0 %vm290_vm1, %v802_v3  ;;  %765 = vmatmul.msk.bf16.gmra.mxu3 %vm290_vm1, %v807_v11 }
  0x21   : > { %465 = vmatpush.bf16.msra.mxu1 %v811_v15  ;;  %823 = vmatpush.bf16.msra.mxu2 %v811_v15 }
  0x25   : > { %466 = vmatpush.bf16.msra.mxu1 %v810_v16  ;;  %824 = vmatpush.bf16.msra.mxu2 %v810_v16  ;;  %v928_v16 = vld [vmem:[%s976_s4] ss:$0 sm:$0xff] }
  0x29   : > { %467 = vmatpush.bf16.msra.mxu1 %v809_v17  ;;  %825 = vmatpush.bf16.msra.mxu2 %v809_v17 }
  0x30   : > { %761 = vmatmul.msk.bf16.gmra.mxu0 %vm290_vm1, %v803_v4  ;;  %766 = vmatmul.msk.bf16.gmra.mxu3 %vm290_vm1, %v808_v13 }
  0x40   : > { %762 = vmatmul.msk.bf16.gmra.mxu0 %vm290_vm1, %v804_v9 }
  0x50   : > { %763 = vmatmul.msk.bf16.gmra.mxu0 %vm290_vm1, %v805_v12 }
  0x8d   : > { %v328_v18 = vpop.f32.mrf.mxu0 }
  0x8e   : > { %v329_v20 = vadd.f32 %v834_v19, %v328_v18 }
  0x90   : > { %v368_v23 = vmax.f32 %v329_v20, 0.0 }
  0x93   : > { %v353_v48 = vpop.f32.mrf.mxu3 }
  0x94   : > { %v354_v57 = vadd.f32 %v834_v19, %v353_v48 }
  0x95   : > { %v330_v21 = vpop.f32.mrf.mxu0 }
  0x96   : > { %v331_v22 = vadd.f32 %v834_v19, %v330_v21  ;;  %v378_v59 = vmax.f32 %v354_v57, 0.0 }
  0x98   : > { %v369_v24 = vmax.f32 %v331_v22, 0.0 }
  0x9a   : > { %v384_v25 = vpack.c.bf16 %v369_v24, %v368_v23 }
  0x9b   : > { %v355_v52 = vpop.f32.mrf.mxu3 }
  0x9c   : > { %468 = vmatmul.bf16.vlgmr.msra.gmra.mxu1 %v384_v25  ;;  %v356_v58 = vadd.f32 %v834_v19, %v355_v52 }
  0x9d   : > { %v333_v26 = vpop.f32.mrf.mxu0 }
  0x9e   : > { %v334_v27 = vadd.f32 %v834_v19, %v333_v26  ;;  %v379_v60 = vmax.f32 %v356_v58, 0.0 }
  0xa0   : > { %v370_v30 = vmax.f32 %v334_v27, 0.0  ;;  %v389_v61 = vpack.c.bf16 %v379_v60, %v378_v59 }
  0xa3   : > { %v358_v56 = vpop.f32.mrf.mxu3 }
  0xa4   : > { %v359_v63 = vadd.f32 %v834_v19, %v358_v56 }
  0xa5   : > { %v335_v28 = vpop.f32.mrf.mxu0 }
  0xa6   : > { %v336_v29 = vadd.f32 %v834_v19, %v335_v28  ;;  %v380_v2 = vmax.f32 %v359_v63, 0.0 }
  0xa8   : > { %v371_v31 = vmax.f32 %v336_v29, 0.0 }
  0xaa   : > { %v385_v32 = vpack.c.bf16 %v371_v31, %v370_v30 }
  0xab   : > { %v360_v62 = vpop.f32.mrf.mxu3 }
  0xac   : > { %473 = vmatmul.bf16.gmra.mxu1 %v385_v32  ;;  %v361_v0 = vadd.f32 %v834_v19, %v360_v62 }
  0xad   : > { %v338_v33 = vpop.f32.mrf.mxu0 }
  0xae   : > { %v339_v34 = vadd.f32 %v834_v19, %v338_v33  ;;  %v381_v3 = vmax.f32 %v361_v0, 0.0 }
  0xb0   : > { %v372_v37 = vmax.f32 %v339_v34, 0.0  ;;  %v390_v4 = vpack.c.bf16 %v381_v3, %v380_v2 }
  0xb3   : > { %v363_v1 = vpop.f32.mrf.mxu3 }
  0xb4   : > { %v364_v6 = vadd.f32 %v834_v19, %v363_v1 }
  0xb5   : > { %v340_v35 = vpop.f32.mrf.mxu0 }
  0xb6   : > { %v341_v36 = vadd.f32 %v834_v19, %v340_v35  ;;  %v382_v8 = vmax.f32 %v364_v6, 0.0 }
  0xb8   : > { %v373_v38 = vmax.f32 %v341_v36, 0.0 }
  0xba   : > { %v386_v39 = vpack.c.bf16 %v373_v38, %v372_v37 }
  0xbb   : > { %v365_v5 = vpop.f32.mrf.mxu3 }
  0xbc   : > { %478 = vmatmul.bf16.gmra.mxu1 %v386_v39  ;;  %v366_v7 = vadd.f32 %v834_v19, %v365_v5 }
  0xbd   : > { %v343_v40 = vpop.f32.mrf.mxu0 }
  0xbe   : > { %v344_v41 = vadd.f32 %v834_v19, %v343_v40  ;;  %v383_v9 = vmax.f32 %v366_v7, 0.0 }
  0xc0   : > { %v374_v44 = vmax.f32 %v344_v41, 0.0  ;;  %v391_v10 = vpack.c.bf16 %v383_v9, %v382_v8 }
  0xc5   : > { %v345_v42 = vpop.f32.mrf.mxu0 }
  0xc6   : > { %v346_v43 = vadd.f32 %v834_v19, %v345_v42 }
  0xc8   : > { %v375_v45 = vmax.f32 %v346_v43, 0.0 }
  0xca   : > { %v387_v46 = vpack.c.bf16 %v375_v45, %v374_v44 }
  0xcc   : > { %483 = vmatmul.bf16.gmra.mxu1 %v387_v46 }
  0xcd   : > { %v348_v47 = vpop.f32.mrf.mxu0 }
  0xce   : > { %v349_v49 = vadd.f32 %v834_v19, %v348_v47 }
  0xd0   : > { %v376_v53 = vmax.f32 %v349_v49, 0.0 }
  0xd5   : > { %v350_v50 = vpop.f32.mrf.mxu0 }
  0xd6   : > { %v351_v51 = vadd.f32 %v834_v19, %v350_v50 }
  0xd8   : > { %v377_v54 = vmax.f32 %v351_v51, 0.0 }
  0xda   : > { %v388_v55 = vpack.c.bf16 %v377_v54, %v376_v53 }
  0xdc   : > { %488 = vmatmul.bf16.vlgmr.msra.gmra.mxu2 %v388_v55 }
  0xec   : > { %493 = vmatmul.bf16.gmra.mxu2 %v389_v61 }
  0xfc   : > { %498 = vmatmul.bf16.gmra.mxu2 %v390_v4 }
 0x10c   : > { %503 = vmatmul.bf16.gmra.mxu2 %v391_v10 }
 0x119   : > { %v469_v11 = vpop.f32.mrf.mxu1 }
 0x11a   : > { %v470_v19 = vadd.f32 %v928_v16, %v469_v11 }
 0x11c   : > { %v509_v25 = vmax.f32 %v470_v19, 0.0 }
 0x11e   : > { %v525_v32 = vrot.slane %v509_v25, 4 }
 0x120   : > { %v526_v39 = vmax.f32 %v509_v25, %v525_v32 }
 0x121   : > { %v471_v12 = vpop.f32.mrf.mxu1 }
 0x122   : > { %v472_v17 = vadd.f32 %v928_v16, %v471_v12  ;;  %v527_v47 = vrot.slane %v526_v39, 2 }
 0x124   : > { %v510_v22 = vmax.f32 %v472_v17, 0.0  ;;  %v528_v56 = vmax.f32 %v526_v39, %v527_v47 }
 0x126   : > { %v531_v29 = vrot.slane %v510_v22, 4  ;;  %v529_v2 = vrot.slane %v528_v56, 1 }
 0x128   : > { %v532_v35 = vmax.f32 %v510_v22, %v531_v29  ;;  %v530_v11 = vmax.f32 %v528_v56, %v529_v2 }
 0x129   : > { %v474_v13 = vpop.f32.mrf.mxu1 }
 0x12a   : > { %v475_v18 = vadd.f32 %v928_v16, %v474_v13  ;;  %v533_v43 = vrot.slane %v532_v35, 2 }
 0x12c   : > { %v511_v23 = vmax.f32 %v475_v18, 0.0  ;;  %v534_v51 = vmax.f32 %v532_v35, %v533_v43 }
 0x12e   : > { %v537_v31 = vrot.slane %v511_v23, 4  ;;  %v535_v61 = vrot.slane %v534_v51, 1 }
 0x130   : > { %v538_v37 = vmax.f32 %v511_v23, %v537_v31  ;;  %v536_v6 = vmax.f32 %v534_v51, %v535_v61 }
 0x131   : > { %v476_v14 = vpop.f32.mrf.mxu1 }
 0x132   : > { %v477_v20 = vadd.f32 %v928_v16, %v476_v14  ;;  %v539_v46 = vrot.slane %v538_v37, 2 }
 0x134   : > { %v512_v26 = vmax.f32 %v477_v20, 0.0  ;;  %v540_v54 = vmax.f32 %v538_v37, %v539_v46 }
 0x136   : > { %v543_v33 = vrot.slane %v512_v26, 4  ;;  %v541_v0 = vrot.slane %v540_v54, 1 }
 0x138   : > { %v544_v40 = vmax.f32 %v512_v26, %v543_v33  ;;  %v542_v9 = vmax.f32 %v540_v54, %v541_v0 }
 0x139   : > { %v479_v15 = vpop.f32.mrf.mxu1 }
 0x13a   : > { %v480_v21 = vadd.f32 %v928_v16, %v479_v15  ;;  %v545_v48 = vrot.slane %v544_v40, 2  ;;  %v638_v15 = vsel %vm637_vm2, %v536_v6, %v530_v11 }
 0x13b   : > { %v640_v19 = vsel %vm639_vm3, %v542_v9, %v638_v15 }
 0x13c   : > { %v513_v28 = vmax.f32 %v480_v21, 0.0  ;;  %v546_v57 = vmax.f32 %v544_v40, %v545_v48 }
 0x13e   : > { %v549_v34 = vrot.slane %v513_v28, 4  ;;  %v547_v3 = vrot.slane %v546_v57, 1 }
 0x140   : > { %v550_v42 = vmax.f32 %v513_v28, %v549_v34  ;;  %v548_v12 = vmax.f32 %v546_v57, %v547_v3 }
 0x141   : > { %v481_v24 = vpop.f32.mrf.mxu1 }
 0x142   : > { %v482_v27 = vadd.f32 %v928_v16, %v481_v24  ;;  %v551_v50 = vrot.slane %v550_v42, 2  ;;  %v642_v21 = vsel %vm641_vm4, %v548_v12, %v640_v19 }
 0x144   : > { %v514_v30 = vmax.f32 %v482_v27, 0.0  ;;  %v552_v60 = vmax.f32 %v550_v42, %v551_v50 }
 0x146   : > { %v555_v36 = vrot.slane %v514_v30, 4  ;;  %v553_v5 = vrot.slane %v552_v60, 1 }
 0x148   : > { %v556_v44 = vmax.f32 %v514_v30, %v555_v36  ;;  %v554_v14 = vmax.f32 %v552_v60, %v553_v5 }
 0x149   : > { %v484_v38 = vpop.f32.mrf.mxu1 }
 0x14a   : > { %v485_v41 = vadd.f32 %v928_v16, %v484_v38  ;;  %v557_v52 = vrot.slane %v556_v44, 2  ;;  %v644_v23 = vsel %vm643_vm5, %v554_v14, %v642_v21 }
 0x14c   : > { %v515_v45 = vmax.f32 %v485_v41, 0.0  ;;  %v558_v62 = vmax.f32 %v556_v44, %v557_v52 }
 0x14e   : > { %v561_v49 = vrot.slane %v515_v45, 4  ;;  %v559_v7 = vrot.slane %v558_v62, 1 }
 0x150   : > { %v562_v53 = vmax.f32 %v515_v45, %v561_v49  ;;  %v560_v17 = vmax.f32 %v558_v62, %v559_v7 }
 0x151   : > { %v486_v55 = vpop.f32.mrf.mxu1 }
 0x152   : > { %v563_v58 = vrot.slane %v562_v53, 2  ;;  %v487_v59 = vadd.f32 %v928_v16, %v486_v55  ;;  %v646_v25 = vsel %vm645_vm6, %v560_v17, %v644_v23 }
 0x154   : > { %v516_v63 = vmax.f32 %v487_v59, 0.0  ;;  %v564_v1 = vmax.f32 %v562_v53, %v563_v58 }
 0x156   : > { %v567_v4 = vrot.slane %v516_v63, 4  ;;  %v565_v10 = vrot.slane %v564_v1, 1 }
 0x158   : > { %v568_v8 = vmax.f32 %v516_v63, %v567_v4  ;;  %v566_v20 = vmax.f32 %v564_v1, %v565_v10 }
 0x15a   : > { %v569_v13 = vrot.slane %v568_v8, 2  ;;  %v648_v27 = vsel %vm647_vm7, %v566_v20, %v646_v25 }
 0x15c   : > { %v570_v18 = vmax.f32 %v568_v8, %v569_v13 }
 0x15e   : > { %v571_v22 = vrot.slane %v570_v18, 1 }
 0x15f   : > { %v489_v24 = vpop.f32.mrf.mxu2 }
 0x160   : > { %v572_v26 = vmax.f32 %v570_v18, %v571_v22  ;;  %v490_v35 = vadd.f32 %v928_v16, %v489_v24 }
 0x162   : > { %v650_v28 = vsel %vm649_vm8, %v572_v26, %v648_v27  ;;  %v517_v41 = vmax.f32 %v490_v35, 0.0 }
 0x163   : > { %660 = vst [vmem:[%s948_s27] sm:$0xff] %v650_v28 }
 0x164   : > { %v573_v48 = vrot.slane %v517_v41, 4 }
 0x166   : > { %v574_v55 = vmax.f32 %v517_v41, %v573_v48 }
 0x167   : > { %v491_v29 = vpop.f32.mrf.mxu2 }
 0x168   : > { %v492_v33 = vadd.f32 %v928_v16, %v491_v29  ;;  %v575_v63 = vrot.slane %v574_v55, 2 }
 0x16a   : > { %v518_v38 = vmax.f32 %v492_v33, 0.0  ;;  %v576_v8 = vmax.f32 %v574_v55, %v575_v63 }
 0x16c   : > { %v579_v45 = vrot.slane %v518_v38, 4  ;;  %v577_v19 = vrot.slane %v576_v8, 1 }
 0x16e   : > { %v580_v51 = vmax.f32 %v518_v38, %v579_v45  ;;  %v578_v28 = vmax.f32 %v576_v8, %v577_v19 }
 0x16f   : > { %v494_v30 = vpop.f32.mrf.mxu2 }
 0x170   : > { %v495_v34 = vadd.f32 %v928_v16, %v494_v30  ;;  %v581_v59 = vrot.slane %v580_v51, 2 }
 0x172   : > { %v519_v39 = vmax.f32 %v495_v34, 0.0  ;;  %v582_v3 = vmax.f32 %v580_v51, %v581_v59 }
 0x174   : > { %v585_v47 = vrot.slane %v519_v39, 4  ;;  %v583_v13 = vrot.slane %v582_v3, 1 }
 0x176   : > { %v586_v53 = vmax.f32 %v519_v39, %v585_v47  ;;  %v584_v23 = vmax.f32 %v582_v3, %v583_v13 }
 0x177   : > { %v496_v31 = vpop.f32.mrf.mxu2 }
 0x178   : > { %v497_v36 = vadd.f32 %v928_v16, %v496_v31  ;;  %v587_v62 = vrot.slane %v586_v53, 2  ;;  %v651_v31 = vsel %vm637_vm2, %v584_v23, %v578_v28 }
 0x17a   : > { %v520_v42 = vmax.f32 %v497_v36, 0.0  ;;  %v588_v6 = vmax.f32 %v586_v53, %v587_v62 }
 0x17c   : > { %v591_v49 = vrot.slane %v520_v42, 4  ;;  %v589_v17 = vrot.slane %v588_v6, 1 }
 0x17e   : > { %v592_v56 = vmax.f32 %v520_v42, %v591_v49  ;;  %v590_v26 = vmax.f32 %v588_v6, %v589_v17 }
 0x17f   : > { %v499_v32 = vpop.f32.mrf.mxu2 }
 0x180   : > { %v500_v37 = vadd.f32 %v928_v16, %v499_v32  ;;  %v593_v0 = vrot.slane %v592_v56, 2  ;;  %v652_v34 = vsel %vm639_vm3, %v590_v26, %v651_v31 }
 0x182   : > { %v521_v44 = vmax.f32 %v500_v37, 0.0  ;;  %v594_v9 = vmax.f32 %v592_v56, %v593_v0 }
 0x184   : > { %v597_v50 = vrot.slane %v521_v44, 4  ;;  %v595_v20 = vrot.slane %v594_v9, 1 }
 0x186   : > { %v598_v58 = vmax.f32 %v521_v44, %v597_v50  ;;  %v596_v29 = vmax.f32 %v594_v9, %v595_v20 }
 0x187   : > { %v501_v40 = vpop.f32.mrf.mxu2 }
 0x188   : > { %v502_v43 = vadd.f32 %v928_v16, %v501_v40  ;;  %v599_v2 = vrot.slane %v598_v58, 2  ;;  %v653_v36 = vsel %vm641_vm4, %v596_v29, %v652_v34 }
 0x18a   : > { %v522_v46 = vmax.f32 %v502_v43, 0.0  ;;  %v600_v12 = vmax.f32 %v598_v58, %v599_v2 }
 0x18c   : > { %v603_v52 = vrot.slane %v522_v46, 4  ;;  %v601_v22 = vrot.slane %v600_v12, 1 }
 0x18e   : > { %v604_v60 = vmax.f32 %v522_v46, %v603_v52 }
 0x18f   : > { %v504_v54 = vpop.f32.mrf.mxu2 }
 0x190   : > { %v505_v57 = vadd.f32 %v928_v16, %v504_v54  ;;  %v605_v4 = vrot.slane %v604_v60, 2 }
 0x192   : > { %v523_v61 = vmax.f32 %v505_v57, 0.0  ;;  %v606_v14 = vmax.f32 %v604_v60, %v605_v4 }
 0x194   : > { %v609_v1 = vrot.slane %v523_v61, 4  ;;  %v607_v24 = vrot.slane %v606_v14, 1 }
 0x196   : > { %v610_v5 = vmax.f32 %v523_v61, %v609_v1  ;;  %v608_v32 = vmax.f32 %v606_v14, %v607_v24 }
 0x197   : > { %v506_v7 = vpop.f32.mrf.mxu2 }
 0x198   : > { %v611_v10 = vrot.slane %v610_v5, 2  ;;  %v507_v11 = vadd.f32 %v928_v16, %v506_v7  ;;  %v602_v16 = vmax.f32 %v600_v12, %v601_v22 }
 0x19a   : > { %v524_v15 = vmax.f32 %v507_v11, 0.0  ;;  %v612_v18 = vmax.f32 %v610_v5, %v611_v10  ;;  %v654_v38 = vsel %vm643_vm5, %v602_v16, %v653_v36 }
 0x19b   : > { %v655_v39 = vsel %vm645_vm6, %v608_v32, %v654_v38 }
 0x19c   : > { %v615_v21 = vrot.slane %v524_v15, 4  ;;  %v613_v27 = vrot.slane %v612_v18, 1 }
 0x19e   : > { %v616_v25 = vmax.f32 %v524_v15, %v615_v21  ;;  %v614_v35 = vmax.f32 %v612_v18, %v613_v27 }
 0x1a0   : > { %v617_v30 = vrot.slane %v616_v25, 2  ;;  %v656_v41 = vsel %vm647_vm7, %v614_v35, %v655_v39 }
 0x1a2   : > { %v618_v33 = vmax.f32 %v616_v25, %v617_v30 }
 0x1a4   : > { %v619_v37 = vrot.slane %v618_v33, 1 }
 0x1a6   : > { %v620_v40 = vmax.f32 %v618_v33, %v619_v37 }
 0x1a8   : > { %v657_v42 = vsel %vm649_vm8, %v620_v40, %v656_v41 }
 0x1a9   : > { %661 = vst [vmem:[%s948_s27 + $0x8] sm:$0xff] %v657_v42 }
 0x1aa PF: > { %s15_s18 = sadd.s32 1, %s842_s18  }
 0x1ab   : > { %p12_p5 = scmp.ge.s32.totalorder %s15_s18, 4  }
 0x1ad   :  { %14 = sbr.rel (!%p12_p5) target bundleno = 1 (0x1), region = 70 }

// kernel: _lambda_.3
= control target key start
LH: loop header
LB: loop body
LE: loop exit
PB: predicated region body
PF: predicated region fallthrough
CT: control target
= control target key end

     0   :  { %s1138_s18 = smov 0   ;;  %s1315_s0 = inlined_call_operand.vmem [shape: bf16[512,6], index: 0, kind: input, shape index: {}]   ;;  %s1316_s1 = inlined_call_operand.vmem [shape: bf16[6,128], index: 1, kind: input, shape index: {}]   ;;  %s1317_s2 = inlined_call_operand.vmem [shape: bf16[128,128], index: 2, kind: input, shape index: {}]   ;;  %s1318_s3 = inlined_call_operand.vmem [shape: f32[1,128], index: 3, kind: input, shape index: {}]   ;;  %s1319_s4 = inlined_call_operand.vmem [shape: f32[1,128], index: 4, kind: input, shape index: {}]   ;;  %s1320_s5 = inlined_call_operand.vmem [shape: f32[32,128], index: 5, kind: output, shape index: {}]  }
   0x1 LB: > { %s934_s19 = sadd.s32 4294967295, %s1106_s18   ;;  %p938_p0 = scmp.ge.s32.totalorder %s1106_s18, 1  ;;  %s1106_s18 = sphi %s1138_s18, %s15_s18  }
   0x2   : > { %p188_p1 = scmp.lt.s32.totalorder %s1106_s18, 3 }
   0x4   : > { %p189_p2 = pnand %p938_p0, %p188_p1 }
   0x5   : > { %s939_s22 = sshll.u32 (!%p189_p2), %s934_s19, 5  ;;  %s941_s24 = sshll.u32 (!%p189_p2), %s934_s19, 1 }
   0x6   : > { %192 = sbr.rel (%p189_p2) target bundleno = 556 (0x22c), region = 40  ;;  %p217_p3 = scmp.lt.s32.totalorder (!%p189_p2), %s939_s22, 63 }
   0x7   : > { %p223_p4 = scmp.lt.s32.totalorder (!%p189_p2), %s941_s24, 3 }
   0xb   : > { %v261_v0 = vld [vmem:[%s1316_s1] sm:$0x7]  ;;  %vm395_vm0 = vcmask 1042432   ;;  %s1322_s22 = smov (!%p217_p3, %s939_s22), 63  ;;  %vm346_vm1 = vcmask 48128   ;;  %v1080_v7 = vld [vmem:[%s1317_s2 + $0x38] sm:$0xff] }
   0xc   : > { %v397_v1 = vsel %vm395_vm0, %v261_v0, 0  ;;  %s940_s23 = sshll.u32 %s1322_s22, 2  ;;  %604 = vmatpush.bf16.msra.mxu1 %v1080_v7  ;;  %1082 = vmatpush.bf16.msra.mxu2 %v1080_v7  ;;  %v1079_v9 = vld [vmem:[%s1317_s2 + $0x30] sm:$0xff]  ;;  %v1078_v10 = vld [vmem:[%s1317_s2 + $0x28] sm:$0xff]  ;;  %v1077_v11 = vld [vmem:[%s1317_s2 + $0x20] sm:$0xff]  ;;  %vm853_vm2 = vcmask 1041409  }
   0xd   : > { %406 = vmatpush.bf16.msra.mxu0 %v397_v1  ;;  %1081 = vmatpush.bf16.msra.mxu3 %v397_v1  ;;  %s1154_s26 = scalar_lea.vmem %s1315_s0, %s940_s23  ;;  %v1076_v12 = vld [vmem:[%s1317_s2 + $0x18] sm:$0xff]  ;;  %v1075_v14 = vld [vmem:[%s1317_s2 + $0x10] sm:$0xff]  ;;  %v1074_v16 = vld [vmem:[%s1317_s2 + $0x8] sm:$0xff]  ;;  %vm855_vm3 = vcmask 1042434   ;;  %vm857_vm4 = vcmask 1043459   ;;  %s1324_s24 = smov (!%p223_p4, %s941_s24), 3 }
   0xe   : > { %v1057_v2 = vld [vmem:[%s1154_s26] sm:$0xff]  ;;  %v1058_v3 = vld [vmem:[%s1154_s26 + $0x8] sm:$0xff]  ;;  %v1059_v4 = vld [vmem:[%s1154_s26 + $0x10] sm:$0xff]  ;;  %vm859_vm5 = vcmask 1044484   ;;  %vm861_vm6 = vcmask 1045509   ;;  %s942_s19 = sshll.u32 %s1324_s24, 3 }
   0xf   : > { %v1060_v5 = vld [vmem:[%s1154_s26 + $0x18] sm:$0xff]  ;;  %v1061_v6 = vld [vmem:[%s1154_s26 + $0x20] sm:$0xff]  ;;  %v1062_v8 = vld [vmem:[%s1154_s26 + $0x28] sm:$0xff]  ;;  %vm863_vm7 = vcmask 1046534   ;;  %vm865_vm8 = vcmask 1047559   ;;  %s1283_s27 = scalar_lea.vmem %s1320_s5, %s942_s19 }
  0x10   : > { %1007 = vmatmul.msk.bf16.vlgmr.msra.gmra.mxu0 %vm346_vm1, %v1057_v2  ;;  %605 = vmatpush.bf16.msra.mxu1 %v1079_v9  ;;  %v1063_v13 = vld [vmem:[%s1154_s26 + $0x30] sm:$0xff]  ;;  %v1066_v15 = vld [vmem:[%s1154_s26 + $0x48] sm:$0xff]  ;;  %v1073_v17 = vld [vmem:[%s1317_s2] sm:$0xff] }
  0x11   : > { %1083 = vmatpush.bf16.msra.mxu2 %v1079_v9  ;;  %1016 = vmatmul.msk.bf16.vlgmr.msra.gmra.mxu3 %vm346_vm1, %v1066_v15  ;;  %v1064_v18 = vld [vmem:[%s1154_s26 + $0x38] sm:$0xff]  ;;  %v1067_v19 = vld [vmem:[%s1154_s26 + $0x50] sm:$0xff]  ;;  %v1065_v20 = vld [vmem:[%s1154_s26 + $0x40] sm:$0xff] }
  0x12   : > { %v1204_v22 = vld [vmem:[%s1318_s3] ss:$0 sm:$0xff]  ;;  %v1068_v23 = vld [vmem:[%s1154_s26 + $0x58] sm:$0xff]  ;;  %v1070_v39 = vld [vmem:[%s1154_s26 + $0x68] sm:$0xff] }
  0x13   : > { %v1069_v31 = vld [vmem:[%s1154_s26 + $0x60] sm:$0xff]  ;;  %v1071_v47 = vld [vmem:[%s1154_s26 + $0x70] sm:$0xff]  ;;  %v1072_v55 = vld [vmem:[%s1154_s26 + $0x78] sm:$0xff] }
  0x14   : > { %606 = vmatpush.bf16.msra.mxu1 %v1078_v10 }
  0x15   : > { %1084 = vmatpush.bf16.msra.mxu2 %v1078_v10 }
  0x18   : > { %607 = vmatpush.bf16.msra.mxu1 %v1077_v11 }
  0x19   : > { %1085 = vmatpush.bf16.msra.mxu2 %v1077_v11 }
  0x1c   : > { %608 = vmatpush.bf16.msra.mxu1 %v1076_v12 }
  0x1d   : > { %1086 = vmatpush.bf16.msra.mxu2 %v1076_v12 }
  0x20   : > { %1008 = vmatmul.msk.bf16.gmra.mxu0 %vm346_vm1, %v1058_v3  ;;  %609 = vmatpush.bf16.msra.mxu1 %v1075_v14 }
  0x21   : > { %1087 = vmatpush.bf16.msra.mxu2 %v1075_v14  ;;  %1017 = vmatmul.msk.bf16.gmra.mxu3 %vm346_vm1, %v1067_v19 }
  0x24   : > { %610 = vmatpush.bf16.msra.mxu1 %v1074_v16 }
  0x25   : > { %1088 = vmatpush.bf16.msra.mxu2 %v1074_v16 }
  0x28   : > { %611 = vmatpush.bf16.msra.mxu1 %v1073_v17 }
  0x29   : > { %1089 = vmatpush.bf16.msra.mxu2 %v1073_v17 }
  0x30   : > { %1009 = vmatmul.msk.bf16.gmra.mxu0 %vm346_vm1, %v1059_v4 }
  0x31   : > { %1018 = vmatmul.msk.bf16.gmra.mxu3 %vm346_vm1, %v1068_v23 }
  0x40   : > { %1010 = vmatmul.msk.bf16.gmra.mxu0 %vm346_vm1, %v1060_v5 }
  0x41   : > { %1019 = vmatmul.msk.bf16.gmra.mxu3 %vm346_vm1, %v1069_v31 }
  0x50   : > { %1011 = vmatmul.msk.bf16.gmra.mxu0 %vm346_vm1, %v1061_v6 }
  0x51   : > { %1020 = vmatmul.msk.bf16.gmra.mxu3 %vm346_vm1, %v1070_v39 }
  0x60   : > { %1012 = vmatmul.msk.bf16.gmra.mxu0 %vm346_vm1, %v1062_v8 }
  0x61   : > { %1021 = vmatmul.msk.bf16.gmra.mxu3 %vm346_vm1, %v1071_v47 }
  0x70   : > { %1013 = vmatmul.msk.bf16.gmra.mxu0 %vm346_vm1, %v1063_v13 }
  0x71   : > { %1022 = vmatmul.msk.bf16.gmra.mxu3 %vm346_vm1, %v1072_v55 }
  0x80   : > { %1014 = vmatmul.msk.bf16.gmra.mxu0 %vm346_vm1, %v1064_v18 }
  0x8d   : > { %v408_v21 = vpop.f32.mrf.mxu0 }
  0x8e   : > { %v409_v24 = vadd.f32 %v1204_v22, %v408_v21 }
  0x90   : > { %1015 = vmatmul.msk.bf16.gmra.mxu0 %vm346_vm1, %v1065_v20  ;;  %v488_v27 = vmax.f32 %v409_v24, 0.0 }
  0x94   : > { %v453_v13 = vpop.f32.mrf.mxu3 }
  0x95   : > { %v410_v25 = vpop.f32.mrf.mxu0 }
  0x96   : > { %v411_v26 = vadd.f32 %v1204_v22, %v410_v25 }
  0x98   : > { %v489_v28 = vmax.f32 %v411_v26, 0.0 }
  0x9a   : > { %v520_v29 = vpack.c.bf16 %v489_v28, %v488_v27 }
  0x9c   : > { %612 = vmatmul.bf16.vlgmr.msra.gmra.mxu1 %v520_v29  ;;  %v455_v17 = vpop.f32.mrf.mxu3 }
  0x9d   : > { %v413_v30 = vpop.f32.mrf.mxu0 }
  0x9e   : > { %v414_v32 = vadd.f32 %v1204_v22, %v413_v30 }
  0xa0   : > { %v490_v35 = vmax.f32 %v414_v32, 0.0  ;;  %v1238_v32 = vld [vmem:[%s1319_s4] ss:$0 sm:$0xff] }
  0xa4   : > { %v458_v23 = vpop.f32.mrf.mxu3 }
  0xa5   : > { %v415_v33 = vpop.f32.mrf.mxu0 }
  0xa6   : > { %v416_v34 = vadd.f32 %v1204_v22, %v415_v33 }
  0xa8   : > { %v491_v36 = vmax.f32 %v416_v34, 0.0 }
  0xaa   : > { %v521_v37 = vpack.c.bf16 %v491_v36, %v490_v35  ;;  %v454_v35 = vadd.f32 %v1204_v22, %v453_v13  ;;  %v456_v36 = vadd.f32 %v1204_v22, %v455_v17 }
  0xac   : > { %617 = vmatmul.bf16.gmra.mxu1 %v521_v37  ;;  %v460_v31 = vpop.f32.mrf.mxu3 }
  0xad   : > { %v418_v38 = vpop.f32.mrf.mxu0 }
  0xae   : > { %v419_v40 = vadd.f32 %v1204_v22, %v418_v38 }
  0xb0   : > { %v492_v43 = vmax.f32 %v419_v40, 0.0 }
  0xb4   : > { %v463_v40 = vpop.f32.mrf.mxu3 }
  0xb5   : > { %v420_v41 = vpop.f32.mrf.mxu0 }
  0xb6   : > { %v421_v42 = vadd.f32 %v1204_v22, %v420_v41  ;;  %v506_v41 = vmax.f32 %v454_v35, 0.0 }
  0xb8   : > { %v493_v44 = vmax.f32 %v421_v42, 0.0  ;;  %v507_v42 = vmax.f32 %v456_v36, 0.0 }
  0xba   : > { %v522_v45 = vpack.c.bf16 %v493_v44, %v492_v43 }
  0xbc   : > { %622 = vmatmul.bf16.gmra.mxu1 %v522_v45  ;;  %v529_v45 = vpack.c.bf16 %v507_v42, %v506_v41  ;;  %v465_v47 = vpop.f32.mrf.mxu3 }
  0xbd   : > { %v423_v46 = vpop.f32.mrf.mxu0 }
  0xbe   : > { %v424_v48 = vadd.f32 %v1204_v22, %v423_v46 }
  0xc0   : > { %v494_v51 = vmax.f32 %v424_v48, 0.0 }
  0xc5   : > { %v425_v49 = vpop.f32.mrf.mxu0 }
  0xc6   : > { %v426_v50 = vadd.f32 %v1204_v22, %v425_v49 }
  0xc8   : > { %v495_v52 = vmax.f32 %v426_v50, 0.0 }
  0xca   : > { %v523_v53 = vpack.c.bf16 %v495_v52, %v494_v51  ;;  %v459_v51 = vadd.f32 %v1204_v22, %v458_v23  ;;  %v461_v52 = vadd.f32 %v1204_v22, %v460_v31 }
  0xcc   : > { %627 = vmatmul.bf16.gmra.mxu1 %v523_v53 }
  0xcd   : > { %v428_v54 = vpop.f32.mrf.mxu0 }
  0xce   : > { %v429_v56 = vadd.f32 %v1204_v22, %v428_v54 }
  0xd0   : > { %v496_v59 = vmax.f32 %v429_v56, 0.0 }
  0xd5   : > { %v430_v57 = vpop.f32.mrf.mxu0 }
  0xd6   : > { %v431_v58 = vadd.f32 %v1204_v22, %v430_v57  ;;  %v508_v57 = vmax.f32 %v459_v51, 0.0 }
  0xd8   : > { %v497_v60 = vmax.f32 %v431_v58, 0.0  ;;  %v509_v58 = vmax.f32 %v461_v52, 0.0 }
  0xda   : > { %v524_v61 = vpack.c.bf16 %v497_v60, %v496_v59 }
  0xdc   : > { %632 = vmatmul.bf16.gmra.mxu1 %v524_v61 }
  0xdd   : > { %v433_v62 = vpop.f32.mrf.mxu0 }
  0xde   : > { %v434_v63 = vadd.f32 %v1204_v22, %v433_v62  ;;  %v468_v62 = vpop.f32.mrf.mxu3 }
  0xe0   : > { %v498_v2 = vmax.f32 %v434_v63, 0.0 }
  0xe5   : > { %v435_v0 = vpop.f32.mrf.mxu0 }
  0xe6   : > { %v436_v1 = vadd.f32 %v1204_v22, %v435_v0  ;;  %v470_v13 = vpop.f32.mrf.mxu3 }
  0xe8   : > { %v499_v3 = vmax.f32 %v436_v1, 0.0  ;;  %v530_v1 = vpack.c.bf16 %v509_v58, %v508_v57 }
  0xea   : > { %v525_v4 = vpack.c.bf16 %v499_v3, %v498_v2 }
  0xec   : > { %637 = vmatmul.bf16.gmra.mxu1 %v525_v4 }
  0xed   : > { %v438_v5 = vpop.f32.mrf.mxu0 }
  0xee   : > { %v439_v6 = vadd.f32 %v1204_v22, %v438_v5 }
  0xf0   : > { %v500_v9 = vmax.f32 %v439_v6, 0.0 }
  0xf5   : > { %v440_v7 = vpop.f32.mrf.mxu0 }
  0xf6   : > { %v441_v8 = vadd.f32 %v1204_v22, %v440_v7  ;;  %v464_v7 = vadd.f32 %v1204_v22, %v463_v40 }
  0xf8   : > { %v501_v10 = vmax.f32 %v441_v8, 0.0  ;;  %v510_v17 = vmax.f32 %v464_v7, 0.0 }
  0xfa   : > { %v526_v11 = vpack.c.bf16 %v501_v10, %v500_v9 }
  0xfc   : > { %642 = vmatmul.bf16.gmra.mxu1 %v526_v11  ;;  %v466_v11 = vadd.f32 %v1204_v22, %v465_v47 }
  0xfd   : > { %v443_v12 = vpop.f32.mrf.mxu0 }
  0xfe   : > { %v444_v14 = vadd.f32 %v1204_v22, %v443_v12 }
 0x100   : > { %v502_v18 = vmax.f32 %v444_v14, 0.0 }
 0x105   : > { %v445_v15 = vpop.f32.mrf.mxu0 }
 0x106   : > { %v446_v16 = vadd.f32 %v1204_v22, %v445_v15 }
 0x108   : > { %v503_v19 = vmax.f32 %v446_v16, 0.0 }
 0x10a   : > { %v527_v20 = vpack.c.bf16 %v503_v19, %v502_v18  ;;  %v511_v18 = vmax.f32 %v466_v11, 0.0 }
 0x10c   : > { %647 = vmatmul.bf16.gmra.mxu1 %v527_v20 }
 0x10d   : > { %v448_v21 = vpop.f32.mrf.mxu0 }
 0x10e   : > { %v449_v24 = vadd.f32 %v1204_v22, %v448_v21 }
 0x110   : > { %v504_v27 = vmax.f32 %v449_v24, 0.0  ;;  %v531_v24 = vpack.c.bf16 %v511_v18, %v510_v17 }
 0x115   : > { %v450_v25 = vpop.f32.mrf.mxu0 }
 0x116   : > { %v451_v26 = vadd.f32 %v1204_v22, %v450_v25 }
 0x118   : > { %v505_v28 = vmax.f32 %v451_v26, 0.0  ;;  %v473_v26 = vpop.f32.mrf.mxu3 }
 0x119   : > { %v613_v29 = vpop.f32.mrf.mxu1 }
 0x11a   : > { %v528_v30 = vpack.c.bf16 %v505_v28, %v504_v27  ;;  %v614_v33 = vadd.f32 %v1238_v32, %v613_v29 }
 0x11c   : > { %652 = vmatmul.bf16.vlgmr.msra.gmra.mxu2 %v528_v30  ;;  %v693_v38 = vmax.f32 %v614_v33, 0.0  ;;  %v469_v33 = vadd.f32 %v1204_v22, %v468_v62 }
 0x120   : > { %v475_v42 = vpop.f32.mrf.mxu3 }
 0x121   : > { %v615_v34 = vpop.f32.mrf.mxu1 }
 0x122   : > { %v616_v37 = vadd.f32 %v1238_v32, %v615_v34  ;;  %v471_v34 = vadd.f32 %v1204_v22, %v470_v13 }
 0x124   : > { %v694_v39 = vmax.f32 %v616_v37, 0.0  ;;  %v513_v40 = vmax.f32 %v471_v34, 0.0 }
 0x126   : > { %v725_v43 = vmax.f32 %v693_v38, %v694_v39  ;;  %v512_v39 = vmax.f32 %v469_v33, 0.0 }
 0x128   : > { %v726_v46 = vrot.slane %v725_v43, 4  ;;  %v478_v51 = vpop.f32.mrf.mxu3 }
 0x129   : > { %v618_v44 = vpop.f32.mrf.mxu1  ;;  %v479_v62 = vadd.f32 %v1204_v22, %v478_v51 }
 0x12a   : > { %v619_v48 = vadd.f32 %v1238_v32, %v618_v44  ;;  %v727_v50 = vmax.f32 %v725_v43, %v726_v46  ;;  %v532_v46 = vpack.c.bf16 %v513_v40, %v512_v39 }
 0x12c   : > { %657 = vmatmul.bf16.gmra.mxu2 %v529_v45  ;;  %v695_v54 = vmax.f32 %v619_v48, 0.0  ;;  %v728_v56 = vrot.slane %v727_v50, 2 }
 0x12e   : > { %v729_v63 = vmax.f32 %v727_v50, %v728_v56 }
 0x130   : > { %v730_v3 = vrot.slane %v729_v63, 1 }
 0x131   : > { %v620_v49 = vpop.f32.mrf.mxu1 }
 0x132   : > { %v621_v53 = vadd.f32 %v1238_v32, %v620_v49  ;;  %v731_v9 = vmax.f32 %v729_v63, %v730_v3 }
 0x134   : > { %v696_v55 = vmax.f32 %v621_v53, 0.0  ;;  %v474_v53 = vadd.f32 %v1204_v22, %v473_v26 }
 0x136   : > { %v732_v59 = vmax.f32 %v695_v54, %v696_v55  ;;  %v476_v54 = vadd.f32 %v1204_v22, %v475_v42  ;;  %v514_v56 = vmax.f32 %v474_v53, 0.0 }
 0x138   : > { %v733_v60 = vrot.slane %v732_v59, 4  ;;  %v515_v57 = vmax.f32 %v476_v54, 0.0 }
 0x139   : > { %v623_v61 = vpop.f32.mrf.mxu1 }
 0x13a   : > { %v734_v0 = vmax.f32 %v732_v59, %v733_v60  ;;  %v624_v6 = vadd.f32 %v1238_v32, %v623_v61  ;;  %v533_v59 = vpack.c.bf16 %v515_v57, %v514_v56  ;;  %v480_v60 = vpop.f32.mrf.mxu3 }
 0x13b   : > { %v481_v63 = vadd.f32 %v1204_v22, %v480_v60 }
 0x13c   : > { %v735_v2 = vrot.slane %v734_v0, 2  ;;  %662 = vmatmul.bf16.gmra.mxu2 %v530_v1  ;;  %v697_v15 = vmax.f32 %v624_v6, 0.0  ;;  %v516_v1 = vmax.f32 %v479_v62, 0.0 }
 0x13e   : > { %v736_v4 = vmax.f32 %v734_v0, %v735_v2  ;;  %v517_v2 = vmax.f32 %v481_v63, 0.0 }
 0x140   : > { %v737_v5 = vrot.slane %v736_v4, 1 }
 0x141   : > { %v625_v8 = vpop.f32.mrf.mxu1 }
 0x142   : > { %v738_v10 = vmax.f32 %v736_v4, %v737_v5  ;;  %v626_v12 = vadd.f32 %v1238_v32, %v625_v8  ;;  %v483_v0 = vpop.f32.mrf.mxu3  ;;  %v534_v4 = vpack.c.bf16 %v517_v2, %v516_v1 }
 0x144   : > { %v854_v14 = vsel %vm853_vm2, %v738_v10, %v731_v9  ;;  %v698_v16 = vmax.f32 %v626_v12, 0.0 }
 0x146   : > { %v739_v19 = vmax.f32 %v697_v15, %v698_v16 }
 0x148   : > { %v740_v20 = vrot.slane %v739_v19, 4 }
 0x149   : > { %v628_v21 = vpop.f32.mrf.mxu1 }
 0x14a   : > { %v741_v23 = vmax.f32 %v739_v19, %v740_v20  ;;  %v629_v29 = vadd.f32 %v1238_v32, %v628_v21  ;;  %v485_v8 = vpop.f32.mrf.mxu3 }
 0x14b   : > { %v486_v15 = vadd.f32 %v1204_v22, %v485_v8 }
 0x14c   : > { %v742_v25 = vrot.slane %v741_v23, 2  ;;  %667 = vmatmul.bf16.gmra.mxu2 %v531_v24  ;;  %v699_v37 = vmax.f32 %v629_v29, 0.0 }
 0x14e   : > { %v743_v27 = vmax.f32 %v741_v23, %v742_v25  ;;  %v519_v25 = vmax.f32 %v486_v15, 0.0 }
 0x150   : > { %v744_v28 = vrot.slane %v743_v27, 1 }
 0x151   : > { %v630_v30 = vpop.f32.mrf.mxu1 }
 0x152   : > { %v745_v31 = vmax.f32 %v743_v27, %v744_v28  ;;  %v631_v35 = vadd.f32 %v1238_v32, %v630_v30 }
 0x154   : > { %v856_v36 = vsel %vm855_vm3, %v745_v31, %v854_v14  ;;  %v700_v38 = vmax.f32 %v631_v35, 0.0  ;;  %v484_v14 = vadd.f32 %v1204_v22, %v483_v0 }
 0x156   : > { %v746_v41 = vmax.f32 %v699_v37, %v700_v38  ;;  %v518_v24 = vmax.f32 %v484_v14, 0.0 }
 0x158   : > { %v747_v43 = vrot.slane %v746_v41, 4  ;;  %v535_v30 = vpack.c.bf16 %v519_v25, %v518_v24 }
 0x159   : > { %v633_v44 = vpop.f32.mrf.mxu1 }
 0x15a   : > { %v748_v45 = vmax.f32 %v746_v41, %v747_v43  ;;  %v634_v7 = vadd.f32 %v1238_v32, %v633_v44 }
 0x15c   : > { %v749_v47 = vrot.slane %v748_v45, 2  ;;  %672 = vmatmul.bf16.gmra.mxu2 %v532_v46  ;;  %v701_v17 = vmax.f32 %v634_v7, 0.0 }
 0x15e   : > { %v750_v48 = vmax.f32 %v748_v45, %v749_v47 }
 0x160   : > { %v751_v49 = vrot.slane %v750_v48, 1 }
 0x161   : > { %v635_v50 = vpop.f32.mrf.mxu1 }
 0x162   : > { %v752_v52 = vmax.f32 %v750_v48, %v751_v49  ;;  %v636_v5 = vadd.f32 %v1238_v32, %v635_v50 }
 0x164   : > { %v1261_v55 = vsel %vm857_vm4, %v752_v52, %v856_v36  ;;  %v702_v10 = vmax.f32 %v636_v5, 0.0 }
 0x166   : > { %v753_v20 = vmax.f32 %v701_v17, %v702_v10 }
 0x168   : > { %v754_v27 = vrot.slane %v753_v20, 4 }
 0x169   : > { %v638_v58 = vpop.f32.mrf.mxu1 }
 0x16a   : > { %v639_v9 = vadd.f32 %v1238_v32, %v638_v58  ;;  %v755_v33 = vmax.f32 %v753_v20, %v754_v27 }
 0x16c   : > { %677 = vmatmul.bf16.gmra.mxu2 %v533_v59  ;;  %v703_v18 = vmax.f32 %v639_v9, 0.0  ;;  %v756_v36 = vrot.slane %v755_v33, 2 }
 0x16e   : > { %v757_v43 = vmax.f32 %v755_v33, %v756_v36 }
 0x170   : > { %v758_v48 = vrot.slane %v757_v43, 1 }
 0x171   : > { %v640_v61 = vpop.f32.mrf.mxu1 }
 0x172   : > { %v641_v6 = vadd.f32 %v1238_v32, %v640_v61  ;;  %v759_v53 = vmax.f32 %v757_v43, %v758_v48 }
 0x174   : > { %v704_v13 = vmax.f32 %v641_v6, 0.0  ;;  %v860_v60 = vsel %vm859_vm5, %v759_v53, %v1261_v55 }
 0x176   : > { %v760_v23 = vmax.f32 %v703_v18, %v704_v13 }
 0x178   : > { %v761_v29 = vrot.slane %v760_v23, 4 }
 0x179   : > { %v643_v3 = vpop.f32.mrf.mxu1 }
 0x17a   : > { %v644_v11 = vadd.f32 %v1238_v32, %v643_v3  ;;  %v762_v22 = vmax.f32 %v760_v23, %v761_v29 }
 0x17c   : > { %682 = vmatmul.bf16.gmra.mxu2 %v534_v4  ;;  %v705_v21 = vmax.f32 %v644_v11, 0.0  ;;  %v763_v38 = vrot.slane %v762_v22, 2 }
 0x17e   : > { %v764_v44 = vmax.f32 %v762_v22, %v763_v38 }
 0x180   : > { %v765_v49 = vrot.slane %v764_v44, 1 }
 0x181   : > { %v645_v12 = vpop.f32.mrf.mxu1 }
 0x182   : > { %v646_v16 = vadd.f32 %v1238_v32, %v645_v12  ;;  %v766_v54 = vmax.f32 %v764_v44, %v765_v49 }
 0x184   : > { %v706_v19 = vmax.f32 %v646_v16, 0.0  ;;  %v862_v61 = vsel %vm861_vm6, %v766_v54, %v860_v60 }
 0x186   : > { %v767_v26 = vmax.f32 %v705_v21, %v706_v19 }
 0x188   : > { %v768_v31 = vrot.slane %v767_v26, 4 }
 0x189   : > { %v648_v28 = vpop.f32.mrf.mxu1 }
 0x18a   : > { %v769_v34 = vmax.f32 %v767_v26, %v768_v31  ;;  %v649_v35 = vadd.f32 %v1238_v32, %v648_v28 }
 0x18c   : > { %687 = vmatmul.bf16.gmra.mxu2 %v535_v30  ;;  %v770_v40 = vrot.slane %v769_v34, 2  ;;  %v707_v41 = vmax.f32 %v649_v35, 0.0 }
 0x18e   : > { %v771_v46 = vmax.f32 %v769_v34, %v770_v40 }
 0x190   : > { %v772_v51 = vrot.slane %v771_v46, 1 }
 0x191   : > { %v650_v37 = vpop.f32.mrf.mxu1 }
 0x192   : > { %v651_v39 = vadd.f32 %v1238_v32, %v650_v37  ;;  %v773_v57 = vmax.f32 %v771_v46, %v772_v51 }
 0x194   : > { %v708_v42 = vmax.f32 %v651_v39, 0.0  ;;  %v864_v63 = vsel %vm863_vm7, %v773_v57, %v862_v61 }
 0x196   : > { %v774_v45 = vmax.f32 %v707_v41, %v708_v42 }
 0x198   : > { %v775_v47 = vrot.slane %v774_v45, 4 }
 0x19a   : > { %v776_v50 = vmax.f32 %v774_v45, %v775_v47 }
 0x19c   : > { %v777_v52 = vrot.slane %v776_v50, 2 }
 0x19e   : > { %v778_v56 = vmax.f32 %v776_v50, %v777_v52 }
 0x19f   : > { %v653_v58 = vpop.f32.mrf.mxu2 }
 0x1a0   : > { %v779_v59 = vrot.slane %v778_v56, 1  ;;  %v654_v1 = vadd.f32 %v1238_v32, %v653_v58 }
 0x1a2   : > { %v780_v62 = vmax.f32 %v778_v56, %v779_v59  ;;  %v709_v3 = vmax.f32 %v654_v1, 0.0 }
 0x1a4   : > { %v866_v0 = vsel %vm865_vm8, %v780_v62, %v864_v63 }
 0x1a5   : > { %876 = vst [vmem:[%s1283_s27] sm:$0xff] %v866_v0 }
 0x1a7   : > { %v655_v2 = vpop.f32.mrf.mxu2 }
 0x1a8   : > { %v656_v55 = vadd.f32 %v1238_v32, %v655_v2 }
 0x1aa   : > { %v710_v4 = vmax.f32 %v656_v55, 0.0 }
 0x1ac   : > { %v781_v5 = vmax.f32 %v709_v3, %v710_v4 }
 0x1ae   : > { %v782_v7 = vrot.slane %v781_v5, 4 }
 0x1af   : > { %v658_v6 = vpop.f32.mrf.mxu2 }
 0x1b0   : > { %v659_v8 = vadd.f32 %v1238_v32, %v658_v6  ;;  %v783_v10 = vmax.f32 %v781_v5, %v782_v7 }
 0x1b2   : > { %v711_v12 = vmax.f32 %v659_v8, 0.0  ;;  %v784_v14 = vrot.slane %v783_v10, 2 }
 0x1b4   : > { %v785_v18 = vmax.f32 %v783_v10, %v784_v14 }
 0x1b6   : > { %v786_v21 = vrot.slane %v785_v18, 1 }
 0x1b7   : > { %v660_v9 = vpop.f32.mrf.mxu2 }
 0x1b8   : > { %v661_v11 = vadd.f32 %v1238_v32, %v660_v9  ;;  %v787_v27 = vmax.f32 %v785_v18, %v786_v21 }
 0x1ba   : > { %v712_v13 = vmax.f32 %v661_v11, 0.0 }
 0x1bc   : > { %v788_v15 = vmax.f32 %v711_v12, %v712_v13 }
 0x1be   : > { %v789_v16 = vrot.slane %v788_v15, 4 }
 0x1bf   : > { %v663_v17 = vpop.f32.mrf.mxu2 }
 0x1c0   : > { %v790_v19 = vmax.f32 %v788_v15, %v789_v16  ;;  %v664_v25 = vadd.f32 %v1238_v32, %v663_v17 }
 0x1c2   : > { %v791_v20 = vrot.slane %v790_v19, 2  ;;  %v713_v31 = vmax.f32 %v664_v25, 0.0 }
 0x1c4   : > { %v792_v23 = vmax.f32 %v790_v19, %v791_v20 }
 0x1c6   : > { %v793_v24 = vrot.slane %v792_v23, 1 }
 0x1c7   : > { %v665_v26 = vpop.f32.mrf.mxu2 }
 0x1c8   : > { %v794_v28 = vmax.f32 %v792_v23, %v793_v24  ;;  %v666_v29 = vadd.f32 %v1238_v32, %v665_v26 }
 0x1ca   : > { %v867_v30 = vsel %vm853_vm2, %v794_v28, %v787_v27  ;;  %v714_v33 = vmax.f32 %v666_v29, 0.0 }
 0x1cc   : > { %v795_v22 = vmax.f32 %v713_v31, %v714_v33 }
 0x1ce   : > { %v796_v34 = vrot.slane %v795_v22, 4 }
 0x1cf   : > { %v668_v35 = vpop.f32.mrf.mxu2 }
 0x1d0   : > { %v797_v36 = vmax.f32 %v795_v22, %v796_v34  ;;  %v669_v40 = vadd.f32 %v1238_v32, %v668_v35 }
 0x1d2   : > { %v798_v37 = vrot.slane %v797_v36, 2  ;;  %v715_v45 = vmax.f32 %v669_v40, 0.0 }
 0x1d4   : > { %v799_v38 = vmax.f32 %v797_v36, %v798_v37 }
 0x1d6   : > { %v800_v39 = vrot.slane %v799_v38, 1 }
 0x1d7   : > { %v670_v41 = vpop.f32.mrf.mxu2 }
 0x1d8   : > { %v801_v42 = vmax.f32 %v799_v38, %v800_v39  ;;  %v671_v43 = vadd.f32 %v1238_v32, %v670_v41 }
 0x1da   : > { %v868_v44 = vsel %vm855_vm3, %v801_v42, %v867_v30  ;;  %v716_v46 = vmax.f32 %v671_v43, 0.0 }
 0x1dc   : > { %v802_v47 = vmax.f32 %v715_v45, %v716_v46 }
 0x1de   : > { %v803_v48 = vrot.slane %v802_v47, 4 }
 0x1df   : > { %v673_v49 = vpop.f32.mrf.mxu2 }
 0x1e0   : > { %v804_v50 = vmax.f32 %v802_v47, %v803_v48  ;;  %v674_v63 = vadd.f32 %v1238_v32, %v673_v49 }
 0x1e2   : > { %v805_v51 = vrot.slane %v804_v50, 2  ;;  %v717_v5 = vmax.f32 %v674_v63, 0.0 }
 0x1e4   : > { %v806_v52 = vmax.f32 %v804_v50, %v805_v51 }
 0x1e6   : > { %v807_v53 = vrot.slane %v806_v52, 1 }
 0x1e7   : > { %v675_v54 = vpop.f32.mrf.mxu2 }
 0x1e8   : > { %v808_v56 = vmax.f32 %v806_v52, %v807_v53  ;;  %v676_v61 = vadd.f32 %v1238_v32, %v675_v54 }
 0x1ea   : > { %v869_v57 = vsel %vm857_vm4, %v808_v56, %v868_v44  ;;  %v718_v1 = vmax.f32 %v676_v61, 0.0 }
 0x1ec   : > { %v809_v8 = vmax.f32 %v717_v5, %v718_v1 }
 0x1ee   : > { %v810_v12 = vrot.slane %v809_v8, 4 }
 0x1ef   : > { %v678_v58 = vpop.f32.mrf.mxu2 }
 0x1f0   : > { %v679_v0 = vadd.f32 %v1238_v32, %v678_v58  ;;  %v811_v16 = vmax.f32 %v809_v8, %v810_v12 }
 0x1f2   : > { %v719_v6 = vmax.f32 %v679_v0, 0.0  ;;  %v812_v20 = vrot.slane %v811_v16, 2 }
 0x1f4   : > { %v813_v28 = vmax.f32 %v811_v16, %v812_v20 }
 0x1f6   : > { %v814_v22 = vrot.slane %v813_v28, 1 }
 0x1f7   : > { %v680_v59 = vpop.f32.mrf.mxu2 }
 0x1f8   : > { %v681_v62 = vadd.f32 %v1238_v32, %v680_v59  ;;  %v815_v38 = vmax.f32 %v813_v28, %v814_v22 }
 0x1fa   : > { %v720_v3 = vmax.f32 %v681_v62, 0.0 }
 0x1fc   : > { %v816_v10 = vmax.f32 %v719_v6, %v720_v3 }
 0x1fe   : > { %v817_v14 = vrot.slane %v816_v10, 4 }
 0x1ff   : > { %v683_v60 = vpop.f32.mrf.mxu2 }
 0x200   : > { %v684_v2 = vadd.f32 %v1238_v32, %v683_v60  ;;  %v818_v17 = vmax.f32 %v816_v10, %v817_v14 }
 0x202   : > { %v721_v9 = vmax.f32 %v684_v2, 0.0  ;;  %v819_v23 = vrot.slane %v818_v17, 2 }
 0x204   : > { %v820_v29 = vmax.f32 %v818_v17, %v819_v23 }
 0x206   : > { %v821_v34 = vrot.slane %v820_v29, 1 }
 0x207   : > { %v685_v55 = vpop.f32.mrf.mxu2 }
 0x208   : > { %v686_v4 = vadd.f32 %v1238_v32, %v685_v55  ;;  %v822_v39 = vmax.f32 %v820_v29, %v821_v34 }
 0x20a   : > { %v722_v7 = vmax.f32 %v686_v4, 0.0 }
 0x20c   : > { %v823_v11 = vmax.f32 %v721_v9, %v722_v7 }
 0x20e   : > { %v824_v15 = vrot.slane %v823_v11, 4 }
 0x20f   : > { %v688_v13 = vpop.f32.mrf.mxu2 }
 0x210   : > { %v825_v18 = vmax.f32 %v823_v11, %v824_v15  ;;  %v689_v19 = vadd.f32 %v1238_v32, %v688_v13 }
 0x212   : > { %v826_v25 = vrot.slane %v825_v18, 2  ;;  %v723_v26 = vmax.f32 %v689_v19, 0.0 }
 0x214   : > { %v827_v31 = vmax.f32 %v825_v18, %v826_v25 }
 0x216   : > { %v828_v36 = vrot.slane %v827_v31, 1 }
 0x217   : > { %v690_v21 = vpop.f32.mrf.mxu2 }
 0x218   : > { %v691_v24 = vadd.f32 %v1238_v32, %v690_v21  ;;  %v829_v41 = vmax.f32 %v827_v31, %v828_v36  ;;  %v870_v32 = vsel %vm859_vm5, %v815_v38, %v869_v57 }
 0x219   : > { %v871_v43 = vsel %vm861_vm6, %v822_v39, %v870_v32 }
 0x21a   : > { %v724_v27 = vmax.f32 %v691_v24, 0.0  ;;  %v872_v45 = vsel %vm863_vm7, %v829_v41, %v871_v43 }
 0x21c   : > { %v830_v30 = vmax.f32 %v723_v26, %v724_v27 }
 0x21e   : > { %v831_v33 = vrot.slane %v830_v30, 4 }
 0x220   : > { %v832_v35 = vmax.f32 %v830_v30, %v831_v33 }
 0x222   : > { %v833_v37 = vrot.slane %v832_v35, 2 }
 0x224   : > { %v834_v40 = vmax.f32 %v832_v35, %v833_v37 }
 0x226   : > { %v835_v42 = vrot.slane %v834_v40, 1 }
 0x228   : > { %v836_v44 = vmax.f32 %v834_v40, %v835_v42 }
 0x22a   : > { %v873_v46 = vsel %vm865_vm8, %v836_v44, %v872_v45 }
 0x22b   : > { %877 = vst [vmem:[%s1283_s27 + $0x8] sm:$0xff] %v873_v46 }
 0x22c PF: > { %s15_s18 = sadd.s32 1, %s1106_s18  }
 0x22d   : > { %p12_p5 = scmp.ge.s32.totalorder %s15_s18, 4  }
 0x22f   :  { %14 = sbr.rel (!%p12_p5) target bundleno = 1 (0x1), region = 70 }

</bundles_post_ra>
